<compile_context>
chip_gen: v7x
topology: tpu7x:2x2x1
jax: 0.10.0
libtpu: 0.0.40
codegen_flags: <defaults>
</compile_context>

<pallas_src>
import functools

import jax
import jax.numpy as jnp
from jax import lax
from jax.experimental import pallas as pl
from jax.experimental.pallas import tpu as pltpu


def _layer_norm(z, gamma, beta, eps):
    # matches LayerNormalization: (z - mu) / (std_unbiased + eps) * a + b
    # exact divide on purpose (tiny tile; approx reciprocal error > f32 test tolerance)
    d = z.shape[-1]
    mu = jnp.mean(z, axis=-1, keepdims=True)
    diff = z - mu
    var_unbiased = jnp.sum(diff * diff, axis=-1, keepdims=True) * (1.0 / (d - 1))
    sigma = jnp.sqrt(var_unbiased)
    return diff / (sigma + eps) * gamma + beta


def encoder_layer_kernel(
    x_ref,        # (B*S, D)
    wbig_ref,     # (D, H*2k + H*D)   [Q(pre-scaled) | K | Wvo] fused along lanes
    w1T_ref,      # (D, inner)
    w2T_ref,      # (inner, D)
    pk_ref,       # (8, max(D, inner)) packed small params (one DMA)
    o_ref,        # (B*S, D)
    *, batch, seq, head_num, k_dim, eps,
):
    x = x_ref[...]                                   # (B*S, D) f32
    d_model = x.shape[-1]
    inner = w1T_ref.shape[-1]

    # ---- unpack the single small-param slab (rows: bo, ln1_a, ln1_b, b1, b2, ln2_a, ln2_b)
    pk = pk_ref[...]
    bo    = pk[0:1, :d_model]
    ln1_a = pk[1:2, :d_model]
    ln1_b = pk[2:3, :d_model]
    b1    = pk[3:4, :inner]
    b2    = pk[4:5, :d_model]
    ln2_a = pk[5:6, :d_model]
    ln2_b = pk[6:7, :d_model]

    # ---- single lane-filling projection: Q (scale folded in), K, and fused V*Wo ----
    proj = jnp.dot(x, wbig_ref[...], preferred_element_type=jnp.float32)  # (B*S, 2Hk+HD)
    k_base = head_num * k_dim
    vo_base = 2 * head_num * k_dim

    # ---- attention scores per (h, b); softmax batched over ALL tiles ----
    score_tiles = []
    for h in range(head_num):                        # static, small head count
        q_h = proj[:, h * k_dim:(h + 1) * k_dim]                       # (B*S, k)
        k_h = proj[:, k_base + h * k_dim: k_base + (h + 1) * k_dim]    # (B*S, k)
        for b in range(batch):
            r0 = b * seq
            # q @ k^T without materializing the transpose (contract last dims).
            s = lax.dot_general(
                q_h[r0:r0 + seq, :], k_h[r0:r0 + seq, :],
                dimension_numbers=(((1,), (1,)), ((), ())),
                preferred_element_type=jnp.float32,
            )                                        # (S, S); 1/sqrt(D) already folded in
            score_tiles.append(s)
    scores = jnp.concatenate(score_tiles, axis=0)    # (H*B*S, S) sublane concat (cheap)
    m = jnp.max(scores, axis=-1, keepdims=True)      # one XLU reduction for all tiles
    e = jnp.exp(scores - m)                          # one EUP pass
    probs = e * pl.reciprocal(jnp.sum(e, axis=-1, keepdims=True), approx=True)

    # ---- per-batch output via the fused Vo projection (no zero-init, no lane concat) ----
    out_blocks = []
    for b in range(batch):
        r0 = b * seq
        blk = None
        for h in range(head_num):
            t0 = (h * batch + b) * seq               # tile order matches score_tiles loop
            p = probs[t0:t0 + seq, :]                                  # (S, S)
            vo = proj[r0:r0 + seq,
                      vo_base + h * d_model: vo_base + (h + 1) * d_model]  # (S, D)
            c = jnp.dot(p, vo, preferred_element_type=jnp.float32)
            blk = c if blk is None else blk + c
        out_blocks.append(blk)
    acc = jnp.concatenate(out_blocks, axis=0)        # (B*S, D)

    # output projection bias + residual + layer norm 1
    attn_out = _layer_norm(acc + bo + x, ln1_a, ln1_b, eps)

    # ---- position-wise feed-forward (Conv1d k=1 == per-position linear) over all rows ----
    h1 = jnp.dot(attn_out, w1T_ref[...], preferred_element_type=jnp.float32) + b1
    h1 = jnp.maximum(h1, 0.0)
    ff = jnp.dot(h1, w2T_ref[...], preferred_element_type=jnp.float32) + b2
    o_ref[...] = _layer_norm(ff + attn_out, ln2_a, ln2_b, eps)


def encoder_layer(x, params, *, head_num, eps=0.001):
    B, S, D = x.shape
    k_dim = params["w_qs"].shape[-1]
    v_dim = params["w_vs"].shape[-1]
    inner = params["w1T"].shape[-1]
    scale = float(D) ** 0.5

    # --- wrapper-side weight fusion (layout plumbing, done once) ---
    # Q (scale folded in), K, and the fused per-head V*Wo blocks, all stacked along lanes
    # into one (D, 2*H*k + H*D) matrix -> single lane-filling matmul in the kernel.
    wq = params["w_qs"] / scale                                  # (H, D, k)
    wk = params["w_ks"]                                          # (H, D, k)
    wv = params["w_vs"]                                          # (H, D, v)
    woT = params["woT"]                                          # (H*v, D)
    wq_flat = jnp.transpose(wq, (1, 0, 2)).reshape(D, head_num * k_dim)
    wk_flat = jnp.transpose(wk, (1, 0, 2)).reshape(D, head_num * k_dim)
    wvo = jnp.concatenate(
        [wv[h] @ woT[h * v_dim:(h + 1) * v_dim, :] for h in range(head_num)],
        axis=-1,
    )                                                            # (D, H*D)
    wbig = jnp.concatenate([wq_flat, wk_flat, wvo], axis=-1)     # (D, 2Hk + HD)

    # Pack the seven tiny params into ONE (8, max(D, inner)) slab -> one DMA.
    width = max(D, inner)

    def _row(v):
        v = jnp.asarray(v, jnp.float32).reshape(1, -1)
        return jnp.pad(v, ((0, 0), (0, width - v.shape[-1])))

    packed = jnp.concatenate(
        [_row(params["bo"]), _row(params["ln1_a"]), _row(params["ln1_b"]),
         _row(params["b1"]), _row(params["b2"]),
         _row(params["ln2_a"]), _row(params["ln2_b"]),
         jnp.zeros((1, width), jnp.float32)],
        axis=0,
    )                                                            # (8, width)

    x_flat = x.reshape(B * S, D)

    kernel = functools.partial(
        encoder_layer_kernel,
        batch=B, seq=S, head_num=head_num, k_dim=k_dim, eps=eps,
    )

    full2 = lambda shape: pl.BlockSpec(shape, lambda i: (0, 0))

    out_flat = pl.pallas_call(
        kernel,
        out_shape=jax.ShapeDtypeStruct((B * S, D), jnp.float32),
        grid=(1,),              # single step: overhead-bound at these shapes
        in_specs=[
            full2((B * S, D)),                                   # x (all rows at once)
            full2((D, 2 * head_num * k_dim + head_num * D)),     # fused [Q|K|Wvo]
            full2((D, inner)),                                   # w1T
            full2((inner, D)),                                   # w2T
            full2((8, width)),                                   # packed small params
        ],
        out_specs=full2((B * S, D)),
        compiler_params=pltpu.CompilerParams(
            dimension_semantics=("arbitrary",),
        ),
    )(x_flat, wbig, params["w1T"], params["w2T"], packed)
    return out_flat.reshape(B, S, D)


def init_params(key, *, model_dim, inner_hid_dim, head_num, k_dim, v_dim):
    ks = jax.random.split(key, 8)

    def xavier_normal(k, shape, fan_in, fan_out):
        std = (2.0 / (fan_in + fan_out)) ** 0.5
        return std * jax.random.normal(k, shape, dtype=jnp.float32)

    # projection weights (head_num, model_dim, k/v_dim), xavier-normal like the module
    w_qs = xavier_normal(ks[0], (head_num, model_dim, k_dim), model_dim, k_dim)
    w_ks = xavier_normal(ks[1], (head_num, model_dim, k_dim), model_dim, k_dim)
    w_vs = xavier_normal(ks[2], (head_num, model_dim, v_dim), model_dim, v_dim)

    # output linear: nn.Linear(head_num*v_dim -> model_dim); store transposed for x @ W^T
    wo = xavier_normal(ks[3], (model_dim, head_num * v_dim), head_num * v_dim, model_dim)
    bo = jnp.zeros((1, model_dim), jnp.float32)

    # feed-forward Conv1d(kernel=1) weights; store transposed (per-position linear)
    w1 = 0.05 * jax.random.normal(ks[4], (inner_hid_dim, model_dim), dtype=jnp.float32)
    b1 = 0.01 * jax.random.normal(ks[5], (1, inner_hid_dim), dtype=jnp.float32)
    w2 = 0.05 * jax.random.normal(ks[6], (model_dim, inner_hid_dim), dtype=jnp.float32)
    b2 = 0.01 * jax.random.normal(ks[7], (1, model_dim), dtype=jnp.float32)

    return {
        "w_qs": w_qs, "w_ks": w_ks, "w_vs": w_vs,
        "woT": wo.T, "bo": bo,
        "ln1_a": jnp.ones((1, model_dim), jnp.float32),
        "ln1_b": jnp.zeros((1, model_dim), jnp.float32),
        "w1T": w1.T, "b1": b1,
        "w2T": w2.T, "b2": b2,
        "ln2_a": jnp.ones((1, model_dim), jnp.float32),
        "ln2_b": jnp.zeros((1, model_dim), jnp.float32),
    }


if __name__ == "__main__":
    # small shapes consistent with the module
    batch, seq, model_dim = 2, 8, 32
    inner_hid_dim, head_num, k_dim, v_dim = 64, 4, 16, 16

    key = jax.random.PRNGKey(0)
    kx, kp = jax.random.split(key)
    x = jax.random.normal(kx, (batch, seq, model_dim), dtype=jnp.float32)
    params = init_params(
        kp, model_dim=model_dim, inner_hid_dim=inner_hid_dim,
        head_num=head_num, k_dim=k_dim, v_dim=v_dim,
    )

    out = encoder_layer(x, params, head_num=head_num)
    out = jax.block_until_ready(out)
    assert out.shape == (batch, seq, model_dim)
    assert bool(jnp.all(jnp.isfinite(out)))
    print("KERNEL_OK")
</pallas_src>

<mosaic_0001>
module attributes {stable_mosaic.version = 11 : i64} {
  func.func @encoder_layer_kernel(%arg0: i32, %arg1: memref<16x32xf32, #tpu.memory_space<vmem>>, %arg2: memref<32x256xf32, #tpu.memory_space<vmem>>, %arg3: memref<32x64xf32, #tpu.memory_space<vmem>>, %arg4: memref<64x32xf32, #tpu.memory_space<vmem>>, %arg5: memref<8x64xf32, #tpu.memory_space<vmem>>, %arg6: memref<16x32xf32, #tpu.memory_space<vmem>>) attributes {dimension_semantics = [#tpu.dimension_semantics<arbitrary>], iteration_bounds = array<i64: 1>, scalar_prefetch = 0 : i64, scratch_operands = 0 : i64, tpu.core_type = #tpu.core_type<tc>, window_params = [{pipeline_mode = #tpu.pipeline_mode<synchronous>, transform_indices = @transform_0, window_bounds = array<i64: 16, 32>}, {pipeline_mode = #tpu.pipeline_mode<synchronous>, transform_indices = @transform_1, window_bounds = array<i64: 32, 256>}, {pipeline_mode = #tpu.pipeline_mode<synchronous>, transform_indices = @transform_2, window_bounds = array<i64: 32, 64>}, {pipeline_mode = #tpu.pipeline_mode<synchronous>, transform_indices = @transform_3, window_bounds = array<i64: 64, 32>}, {pipeline_mode = #tpu.pipeline_mode<synchronous>, transform_indices = @transform_4, window_bounds = array<i64: 8, 64>}, {pipeline_mode = #tpu.pipeline_mode<synchronous>, transform_indices = @transform_5, window_bounds = array<i64: 16, 32>}]} {
    %c0 = arith.constant 0 : index
    %c0_0 = arith.constant 0 : index
    %0 = vector.load %arg1[%c0, %c0_0] : memref<16x32xf32, #tpu.memory_space<vmem>>, vector<16x32xf32>
    %c0_1 = arith.constant 0 : index
    %c0_2 = arith.constant 0 : index
    %1 = vector.load %arg5[%c0_1, %c0_2] : memref<8x64xf32, #tpu.memory_space<vmem>>, vector<8x64xf32>
    %2 = vector.extract_strided_slice %1 {offsets = [0, 0], sizes = [1, 32], strides = [1, 1]} : vector<8x64xf32> to vector<1x32xf32>
    %3 = vector.extract_strided_slice %1 {offsets = [1, 0], sizes = [1, 32], strides = [1, 1]} : vector<8x64xf32> to vector<1x32xf32>
    %4 = vector.extract_strided_slice %1 {offsets = [2, 0], sizes = [1, 32], strides = [1, 1]} : vector<8x64xf32> to vector<1x32xf32>
    %5 = vector.extract_strided_slice %1 {offsets = [3, 0], sizes = [1, 64], strides = [1, 1]} : vector<8x64xf32> to vector<1x64xf32>
    %6 = vector.extract_strided_slice %1 {offsets = [4, 0], sizes = [1, 32], strides = [1, 1]} : vector<8x64xf32> to vector<1x32xf32>
    %7 = vector.extract_strided_slice %1 {offsets = [5, 0], sizes = [1, 32], strides = [1, 1]} : vector<8x64xf32> to vector<1x32xf32>
    %8 = vector.extract_strided_slice %1 {offsets = [6, 0], sizes = [1, 32], strides = [1, 1]} : vector<8x64xf32> to vector<1x32xf32>
    %c0_3 = arith.constant 0 : index
    %c0_4 = arith.constant 0 : index
    %9 = vector.load %arg2[%c0_3, %c0_4] : memref<32x256xf32, #tpu.memory_space<vmem>>, vector<32x256xf32>
    %cst = arith.constant dense<0.000000e+00> : vector<16x256xf32>
    %10 = tpu.matmul %0, %9, %cst {dimension_numbers = #tpu.dot_dimension_numbers<[1], [0], [0], [1], [0, 0, 1, 1], [], []>} : vector<16x32xf32>, vector<32x256xf32>, vector<16x256xf32> -> vector<16x256xf32>
    %11 = vector.extract_strided_slice %10 {offsets = [0, 0], sizes = [16, 16], strides = [1, 1]} : vector<16x256xf32> to vector<16x16xf32>
    %12 = vector.extract_strided_slice %10 {offsets = [0, 64], sizes = [16, 16], strides = [1, 1]} : vector<16x256xf32> to vector<16x16xf32>
    %13 = vector.extract_strided_slice %11 {offsets = [0, 0], sizes = [8, 16], strides = [1, 1]} : vector<16x16xf32> to vector<8x16xf32>
    %14 = vector.extract_strided_slice %12 {offsets = [0, 0], sizes = [8, 16], strides = [1, 1]} : vector<16x16xf32> to vector<8x16xf32>
    %cst_5 = arith.constant dense<0.000000e+00> : vector<8x8xf32>
    %15 = tpu.matmul %13, %14, %cst_5 {dimension_numbers = #tpu.dot_dimension_numbers<[1], [1], [0], [0], [0, 0, 1, 0], [], []>} : vector<8x16xf32>, vector<8x16xf32>, vector<8x8xf32> -> vector<8x8xf32>
    %16 = vector.extract_strided_slice %11 {offsets = [8, 0], sizes = [8, 16], strides = [1, 1]} : vector<16x16xf32> to vector<8x16xf32>
    %17 = vector.extract_strided_slice %12 {offsets = [8, 0], sizes = [8, 16], strides = [1, 1]} : vector<16x16xf32> to vector<8x16xf32>
    %cst_6 = arith.constant dense<0.000000e+00> : vector<8x8xf32>
    %18 = tpu.matmul %16, %17, %cst_6 {dimension_numbers = #tpu.dot_dimension_numbers<[1], [1], [0], [0], [0, 0, 1, 0], [], []>} : vector<8x16xf32>, vector<8x16xf32>, vector<8x8xf32> -> vector<8x8xf32>
    %19 = vector.extract_strided_slice %10 {offsets = [0, 16], sizes = [16, 16], strides = [1, 1]} : vector<16x256xf32> to vector<16x16xf32>
    %20 = vector.extract_strided_slice %10 {offsets = [0, 80], sizes = [16, 16], strides = [1, 1]} : vector<16x256xf32> to vector<16x16xf32>
    %21 = vector.extract_strided_slice %19 {offsets = [0, 0], sizes = [8, 16], strides = [1, 1]} : vector<16x16xf32> to vector<8x16xf32>
    %22 = vector.extract_strided_slice %20 {offsets = [0, 0], sizes = [8, 16], strides = [1, 1]} : vector<16x16xf32> to vector<8x16xf32>
    %cst_7 = arith.constant dense<0.000000e+00> : vector<8x8xf32>
    %23 = tpu.matmul %21, %22, %cst_7 {dimension_numbers = #tpu.dot_dimension_numbers<[1], [1], [0], [0], [0, 0, 1, 0], [], []>} : vector<8x16xf32>, vector<8x16xf32>, vector<8x8xf32> -> vector<8x8xf32>
    %24 = vector.extract_strided_slice %19 {offsets = [8, 0], sizes = [8, 16], strides = [1, 1]} : vector<16x16xf32> to vector<8x16xf32>
    %25 = vector.extract_strided_slice %20 {offsets = [8, 0], sizes = [8, 16], strides = [1, 1]} : vector<16x16xf32> to vector<8x16xf32>
    %cst_8 = arith.constant dense<0.000000e+00> : vector<8x8xf32>
    %26 = tpu.matmul %24, %25, %cst_8 {dimension_numbers = #tpu.dot_dimension_numbers<[1], [1], [0], [0], [0, 0, 1, 0], [], []>} : vector<8x16xf32>, vector<8x16xf32>, vector<8x8xf32> -> vector<8x8xf32>
    %27 = vector.extract_strided_slice %10 {offsets = [0, 32], sizes = [16, 16], strides = [1, 1]} : vector<16x256xf32> to vector<16x16xf32>
    %28 = vector.extract_strided_slice %10 {offsets = [0, 96], sizes = [16, 16], strides = [1, 1]} : vector<16x256xf32> to vector<16x16xf32>
    %29 = vector.extract_strided_slice %27 {offsets = [0, 0], sizes = [8, 16], strides = [1, 1]} : vector<16x16xf32> to vector<8x16xf32>
    %30 = vector.extract_strided_slice %28 {offsets = [0, 0], sizes = [8, 16], strides = [1, 1]} : vector<16x16xf32> to vector<8x16xf32>
    %cst_9 = arith.constant dense<0.000000e+00> : vector<8x8xf32>
    %31 = tpu.matmul %29, %30, %cst_9 {dimension_numbers = #tpu.dot_dimension_numbers<[1], [1], [0], [0], [0, 0, 1, 0], [], []>} : vector<8x16xf32>, vector<8x16xf32>, vector<8x8xf32> -> vector<8x8xf32>
    %32 = vector.extract_strided_slice %27 {offsets = [8, 0], sizes = [8, 16], strides = [1, 1]} : vector<16x16xf32> to vector<8x16xf32>
    %33 = vector.extract_strided_slice %28 {offsets = [8, 0], sizes = [8, 16], strides = [1, 1]} : vector<16x16xf32> to vector<8x16xf32>
    %cst_10 = arith.constant dense<0.000000e+00> : vector<8x8xf32>
    %34 = tpu.matmul %32, %33, %cst_10 {dimension_numbers = #tpu.dot_dimension_numbers<[1], [1], [0], [0], [0, 0, 1, 0], [], []>} : vector<8x16xf32>, vector<8x16xf32>, vector<8x8xf32> -> vector<8x8xf32>
    %35 = vector.extract_strided_slice %10 {offsets = [0, 48], sizes = [16, 16], strides = [1, 1]} : vector<16x256xf32> to vector<16x16xf32>
    %36 = vector.extract_strided_slice %10 {offsets = [0, 112], sizes = [16, 16], strides = [1, 1]} : vector<16x256xf32> to vector<16x16xf32>
    %37 = vector.extract_strided_slice %35 {offsets = [0, 0], sizes = [8, 16], strides = [1, 1]} : vector<16x16xf32> to vector<8x16xf32>
    %38 = vector.extract_strided_slice %36 {offsets = [0, 0], sizes = [8, 16], strides = [1, 1]} : vector<16x16xf32> to vector<8x16xf32>
    %cst_11 = arith.constant dense<0.000000e+00> : vector<8x8xf32>
    %39 = tpu.matmul %37, %38, %cst_11 {dimension_numbers = #tpu.dot_dimension_numbers<[1], [1], [0], [0], [0, 0, 1, 0], [], []>} : vector<8x16xf32>, vector<8x16xf32>, vector<8x8xf32> -> vector<8x8xf32>
    %40 = vector.extract_strided_slice %35 {offsets = [8, 0], sizes = [8, 16], strides = [1, 1]} : vector<16x16xf32> to vector<8x16xf32>
    %41 = vector.extract_strided_slice %36 {offsets = [8, 0], sizes = [8, 16], strides = [1, 1]} : vector<16x16xf32> to vector<8x16xf32>
    %cst_12 = arith.constant dense<0.000000e+00> : vector<8x8xf32>
    %42 = tpu.matmul %40, %41, %cst_12 {dimension_numbers = #tpu.dot_dimension_numbers<[1], [1], [0], [0], [0, 0, 1, 0], [], []>} : vector<8x16xf32>, vector<8x16xf32>, vector<8x8xf32> -> vector<8x8xf32>
    %43 = tpu.concatenate %15, %18, %23, %26, %31, %34, %39, %42 in 0 : vector<8x8xf32>, vector<8x8xf32>, vector<8x8xf32>, vector<8x8xf32>, vector<8x8xf32>, vector<8x8xf32>, vector<8x8xf32>, vector<8x8xf32> -> vector<64x8xf32>
    %cst_13 = arith.constant dense<0xFF800000> : vector<64xf32>
    %44 = vector.multi_reduction <maximumf>, %43, %cst_13 [1] : vector<64x8xf32> to vector<64xf32>
    %45 = vector.shape_cast %44 : vector<64xf32> to vector<64x1xf32>
    %46 = vector.broadcast %45 : vector<64x1xf32> to vector<64x8xf32>
    %47 = arith.subf %43, %46 : vector<64x8xf32>
    %48 = math.exp %47 : vector<64x8xf32>
    %cst_14 = arith.constant dense<0.000000e+00> : vector<64xf32>
    %49 = vector.multi_reduction <add>, %48, %cst_14 [1] : vector<64x8xf32> to vector<64xf32>
    %50 = vector.shape_cast %49 : vector<64xf32> to vector<64x1xf32>
    %51 = tpu.reciprocal %50 {approx = true} : vector<64x1xf32> -> vector<64x1xf32>
    %52 = vector.broadcast %51 : vector<64x1xf32> to vector<64x8xf32>
    %53 = arith.mulf %48, %52 : vector<64x8xf32>
    %54 = vector.extract_strided_slice %53 {offsets = [0, 0], sizes = [8, 8], strides = [1, 1]} : vector<64x8xf32> to vector<8x8xf32>
    %55 = vector.extract_strided_slice %10 {offsets = [0, 128], sizes = [8, 32], strides = [1, 1]} : vector<16x256xf32> to vector<8x32xf32>
    %cst_15 = arith.constant dense<0.000000e+00> : vector<8x32xf32>
    %56 = tpu.matmul %54, %55, %cst_15 {dimension_numbers = #tpu.dot_dimension_numbers<[1], [0], [0], [1], [0, 0, 1, 1], [], []>} : vector<8x8xf32>, vector<8x32xf32>, vector<8x32xf32> -> vector<8x32xf32>
    %57 = vector.extract_strided_slice %53 {offsets = [16, 0], sizes = [8, 8], strides = [1, 1]} : vector<64x8xf32> to vector<8x8xf32>
    %58 = vector.extract_strided_slice %10 {offsets = [0, 160], sizes = [8, 32], strides = [1, 1]} : vector<16x256xf32> to vector<8x32xf32>
    %cst_16 = arith.constant dense<0.000000e+00> : vector<8x32xf32>
    %59 = tpu.matmul %57, %58, %cst_16 {dimension_numbers = #tpu.dot_dimension_numbers<[1], [0], [0], [1], [0, 0, 1, 1], [], []>} : vector<8x8xf32>, vector<8x32xf32>, vector<8x32xf32> -> vector<8x32xf32>
    %60 = arith.addf %56, %59 : vector<8x32xf32>
    %61 = vector.extract_strided_slice %53 {offsets = [32, 0], sizes = [8, 8], strides = [1, 1]} : vector<64x8xf32> to vector<8x8xf32>
    %62 = vector.extract_strided_slice %10 {offsets = [0, 192], sizes = [8, 32], strides = [1, 1]} : vector<16x256xf32> to vector<8x32xf32>
    %cst_17 = arith.constant dense<0.000000e+00> : vector<8x32xf32>
    %63 = tpu.matmul %61, %62, %cst_17 {dimension_numbers = #tpu.dot_dimension_numbers<[1], [0], [0], [1], [0, 0, 1, 1], [], []>} : vector<8x8xf32>, vector<8x32xf32>, vector<8x32xf32> -> vector<8x32xf32>
    %64 = arith.addf %60, %63 : vector<8x32xf32>
    %65 = vector.extract_strided_slice %53 {offsets = [48, 0], sizes = [8, 8], strides = [1, 1]} : vector<64x8xf32> to vector<8x8xf32>
    %66 = vector.extract_strided_slice %10 {offsets = [0, 224], sizes = [8, 32], strides = [1, 1]} : vector<16x256xf32> to vector<8x32xf32>
    %cst_18 = arith.constant dense<0.000000e+00> : vector<8x32xf32>
    %67 = tpu.matmul %65, %66, %cst_18 {dimension_numbers = #tpu.dot_dimension_numbers<[1], [0], [0], [1], [0, 0, 1, 1], [], []>} : vector<8x8xf32>, vector<8x32xf32>, vector<8x32xf32> -> vector<8x32xf32>
    %68 = arith.addf %64, %67 : vector<8x32xf32>
    %69 = vector.extract_strided_slice %53 {offsets = [8, 0], sizes = [8, 8], strides = [1, 1]} : vector<64x8xf32> to vector<8x8xf32>
    %70 = vector.extract_strided_slice %10 {offsets = [8, 128], sizes = [8, 32], strides = [1, 1]} : vector<16x256xf32> to vector<8x32xf32>
    %cst_19 = arith.constant dense<0.000000e+00> : vector<8x32xf32>
    %71 = tpu.matmul %69, %70, %cst_19 {dimension_numbers = #tpu.dot_dimension_numbers<[1], [0], [0], [1], [0, 0, 1, 1], [], []>} : vector<8x8xf32>, vector<8x32xf32>, vector<8x32xf32> -> vector<8x32xf32>
    %72 = vector.extract_strided_slice %53 {offsets = [24, 0], sizes = [8, 8], strides = [1, 1]} : vector<64x8xf32> to vector<8x8xf32>
    %73 = vector.extract_strided_slice %10 {offsets = [8, 160], sizes = [8, 32], strides = [1, 1]} : vector<16x256xf32> to vector<8x32xf32>
    %cst_20 = arith.constant dense<0.000000e+00> : vector<8x32xf32>
    %74 = tpu.matmul %72, %73, %cst_20 {dimension_numbers = #tpu.dot_dimension_numbers<[1], [0], [0], [1], [0, 0, 1, 1], [], []>} : vector<8x8xf32>, vector<8x32xf32>, vector<8x32xf32> -> vector<8x32xf32>
    %75 = arith.addf %71, %74 : vector<8x32xf32>
    %76 = vector.extract_strided_slice %53 {offsets = [40, 0], sizes = [8, 8], strides = [1, 1]} : vector<64x8xf32> to vector<8x8xf32>
    %77 = vector.extract_strided_slice %10 {offsets = [8, 192], sizes = [8, 32], strides = [1, 1]} : vector<16x256xf32> to vector<8x32xf32>
    %cst_21 = arith.constant dense<0.000000e+00> : vector<8x32xf32>
    %78 = tpu.matmul %76, %77, %cst_21 {dimension_numbers = #tpu.dot_dimension_numbers<[1], [0], [0], [1], [0, 0, 1, 1], [], []>} : vector<8x8xf32>, vector<8x32xf32>, vector<8x32xf32> -> vector<8x32xf32>
    %79 = arith.addf %75, %78 : vector<8x32xf32>
    %80 = vector.extract_strided_slice %53 {offsets = [56, 0], sizes = [8, 8], strides = [1, 1]} : vector<64x8xf32> to vector<8x8xf32>
    %81 = vector.extract_strided_slice %10 {offsets = [8, 224], sizes = [8, 32], strides = [1, 1]} : vector<16x256xf32> to vector<8x32xf32>
    %cst_22 = arith.constant dense<0.000000e+00> : vector<8x32xf32>
    %82 = tpu.matmul %80, %81, %cst_22 {dimension_numbers = #tpu.dot_dimension_numbers<[1], [0], [0], [1], [0, 0, 1, 1], [], []>} : vector<8x8xf32>, vector<8x32xf32>, vector<8x32xf32> -> vector<8x32xf32>
    %83 = arith.addf %79, %82 : vector<8x32xf32>
    %84 = tpu.concatenate %68, %83 in 0 : vector<8x32xf32>, vector<8x32xf32> -> vector<16x32xf32>
    %85 = vector.broadcast %2 : vector<1x32xf32> to vector<16x32xf32>
    %86 = arith.addf %84, %85 : vector<16x32xf32>
    %87 = arith.addf %86, %0 : vector<16x32xf32>
    %cst_23 = arith.constant dense<0.000000e+00> : vector<16xf32>
    %88 = vector.multi_reduction <add>, %87, %cst_23 [1] : vector<16x32xf32> to vector<16xf32>
    %89 = vector.shape_cast %88 : vector<16xf32> to vector<16x1xf32>
    %cst_24 = arith.constant 3.200000e+01 : f32
    %90 = vector.broadcast %cst_24 : f32 to vector<16x1xf32>
    %91 = arith.divf %89, %90 : vector<16x1xf32>
    %92 = vector.broadcast %91 : vector<16x1xf32> to vector<16x32xf32>
    %93 = arith.subf %87, %92 : vector<16x32xf32>
    %94 = arith.mulf %93, %93 : vector<16x32xf32>
    %cst_25 = arith.constant dense<0.000000e+00> : vector<16xf32>
    %95 = vector.multi_reduction <add>, %94, %cst_25 [1] : vector<16x32xf32> to vector<16xf32>
    %96 = vector.shape_cast %95 : vector<16xf32> to vector<16x1xf32>
    %cst_26 = arith.constant 0.0322580636 : f32
    %97 = vector.broadcast %cst_26 : f32 to vector<16x1xf32>
    %98 = arith.mulf %96, %97 : vector<16x1xf32>
    %99 = math.sqrt %98 : vector<16x1xf32>
    %cst_27 = arith.constant 1.000000e-03 : f32
    %100 = vector.broadcast %cst_27 : f32 to vector<16x1xf32>
    %101 = arith.addf %99, %100 : vector<16x1xf32>
    %102 = vector.broadcast %101 : vector<16x1xf32> to vector<16x32xf32>
    %103 = arith.divf %93, %102 : vector<16x32xf32>
    %104 = vector.broadcast %3 : vector<1x32xf32> to vector<16x32xf32>
    %105 = arith.mulf %103, %104 : vector<16x32xf32>
    %106 = vector.broadcast %4 : vector<1x32xf32> to vector<16x32xf32>
    %107 = arith.addf %105, %106 : vector<16x32xf32>
    %c0_28 = arith.constant 0 : index
    %c0_29 = arith.constant 0 : index
    %108 = vector.load %arg3[%c0_28, %c0_29] : memref<32x64xf32, #tpu.memory_space<vmem>>, vector<32x64xf32>
    %cst_30 = arith.constant dense<0.000000e+00> : vector<16x64xf32>
    %109 = tpu.matmul %107, %108, %cst_30 {dimension_numbers = #tpu.dot_dimension_numbers<[1], [0], [0], [1], [0, 0, 1, 1], [], []>} : vector<16x32xf32>, vector<32x64xf32>, vector<16x64xf32> -> vector<16x64xf32>
    %110 = vector.broadcast %5 : vector<1x64xf32> to vector<16x64xf32>
    %111 = arith.addf %109, %110 : vector<16x64xf32>
    %cst_31 = arith.constant 0.000000e+00 : f32
    %112 = vector.broadcast %cst_31 : f32 to vector<16x64xf32>
    %113 = arith.maximumf %111, %112 : vector<16x64xf32>
    %c0_32 = arith.constant 0 : index
    %c0_33 = arith.constant 0 : index
    %114 = vector.load %arg4[%c0_32, %c0_33] : memref<64x32xf32, #tpu.memory_space<vmem>>, vector<64x32xf32>
    %cst_34 = arith.constant dense<0.000000e+00> : vector<16x32xf32>
    %115 = tpu.matmul %113, %114, %cst_34 {dimension_numbers = #tpu.dot_dimension_numbers<[1], [0], [0], [1], [0, 0, 1, 1], [], []>} : vector<16x64xf32>, vector<64x32xf32>, vector<16x32xf32> -> vector<16x32xf32>
    %116 = vector.broadcast %6 : vector<1x32xf32> to vector<16x32xf32>
    %117 = arith.addf %115, %116 : vector<16x32xf32>
    %118 = arith.addf %117, %107 : vector<16x32xf32>
    %cst_35 = arith.constant dense<0.000000e+00> : vector<16xf32>
    %119 = vector.multi_reduction <add>, %118, %cst_35 [1] : vector<16x32xf32> to vector<16xf32>
    %120 = vector.shape_cast %119 : vector<16xf32> to vector<16x1xf32>
    %cst_36 = arith.constant 3.200000e+01 : f32
    %121 = vector.broadcast %cst_36 : f32 to vector<16x1xf32>
    %122 = arith.divf %120, %121 : vector<16x1xf32>
    %123 = vector.broadcast %122 : vector<16x1xf32> to vector<16x32xf32>
    %124 = arith.subf %118, %123 : vector<16x32xf32>
    %125 = arith.mulf %124, %124 : vector<16x32xf32>
    %cst_37 = arith.constant dense<0.000000e+00> : vector<16xf32>
    %126 = vector.multi_reduction <add>, %125, %cst_37 [1] : vector<16x32xf32> to vector<16xf32>
    %127 = vector.shape_cast %126 : vector<16xf32> to vector<16x1xf32>
    %cst_38 = arith.constant 0.0322580636 : f32
    %128 = vector.broadcast %cst_38 : f32 to vector<16x1xf32>
    %129 = arith.mulf %127, %128 : vector<16x1xf32>
    %130 = math.sqrt %129 : vector<16x1xf32>
    %cst_39 = arith.constant 1.000000e-03 : f32
    %131 = vector.broadcast %cst_39 : f32 to vector<16x1xf32>
    %132 = arith.addf %130, %131 : vector<16x1xf32>
    %133 = vector.broadcast %132 : vector<16x1xf32> to vector<16x32xf32>
    %134 = arith.divf %124, %133 : vector<16x32xf32>
    %135 = vector.broadcast %7 : vector<1x32xf32> to vector<16x32xf32>
    %136 = arith.mulf %134, %135 : vector<16x32xf32>
    %137 = vector.broadcast %8 : vector<1x32xf32> to vector<16x32xf32>
    %138 = arith.addf %136, %137 : vector<16x32xf32>
    %c0_40 = arith.constant 0 : index
    %c0_41 = arith.constant 0 : index
    %139 = vector.load %arg6[%c0_40, %c0_41] : memref<16x32xf32, #tpu.memory_space<vmem>>, vector<16x32xf32>
    tpu.vector_store %arg6[%c0_40, %c0_41], %138 {strides = array<i32>} : memref<16x32xf32, #tpu.memory_space<vmem>>, vector<16x32xf32>,
    return
  }
  func.func @transform_0(%arg0: i32) -> (i32, i32) {
    %c0_i32 = arith.constant 0 : i32
    %c0_i32_0 = arith.constant 0 : i32
    %c0_i32_1 = arith.constant 0 : i32
    return %c0_i32, %c0_i32_0 : i32, i32
  }
  func.func @transform_1(%arg0: i32) -> (i32, i32) {
    %c0_i32 = arith.constant 0 : i32
    %c0_i32_0 = arith.constant 0 : i32
    %c0_i32_1 = arith.constant 0 : i32
    return %c0_i32, %c0_i32_0 : i32, i32
  }
  func.func @transform_2(%arg0: i32) -> (i32, i32) {
    %c0_i32 = arith.constant 0 : i32
    %c0_i32_0 = arith.constant 0 : i32
    %c0_i32_1 = arith.constant 0 : i32
    return %c0_i32, %c0_i32_0 : i32, i32
  }
  func.func @transform_3(%arg0: i32) -> (i32, i32) {
    %c0_i32 = arith.constant 0 : i32
    %c0_i32_0 = arith.constant 0 : i32
    %c0_i32_1 = arith.constant 0 : i32
    return %c0_i32, %c0_i32_0 : i32, i32
  }
  func.func @transform_4(%arg0: i32) -> (i32, i32) {
    %c0_i32 = arith.constant 0 : i32
    %c0_i32_0 = arith.constant 0 : i32
    %c0_i32_1 = arith.constant 0 : i32
    return %c0_i32, %c0_i32_0 : i32, i32
  }
  func.func @transform_5(%arg0: i32) -> (i32, i32) {
    %c0_i32 = arith.constant 0 : i32
    %c0_i32_0 = arith.constant 0 : i32
    %c0_i32_1 = arith.constant 0 : i32
    return %c0_i32, %c0_i32_0 : i32, i32
  }
}

</mosaic_0001>

<bundles_post_ra>
// kernel: tpu_custom_call.1
= control target key start
LH: loop header
LB: loop body
LE: loop exit
PB: predicated region body
PF: predicated region fallthrough
CT: control target
= control target key end

     0   :  { %10 = vsyncpa [#allocation3], 0  ;;  %s2418_s0 = inlined_call_operand.hbm [shape: f32[16,32], index: 0, kind: input, shape index: {}]   ;;  %s2419_s1 = inlined_call_operand.vmem [shape: f32[32,256], index: 1, kind: input, shape index: {}]   ;;  %s2420_s2 = inlined_call_operand.vmem [shape: f32[32,64], index: 2, kind: input, shape index: {}]   ;;  %s2421_s3 = inlined_call_operand.vmem [shape: f32[64,32], index: 3, kind: input, shape index: {}]   ;;  %s2422_s4 = inlined_call_operand.vmem [shape: f32[8,64], index: 4, kind: input, shape index: {}]   ;;  %s2423_s5 = inlined_call_operand.hbm [shape: f32[16,32], index: 5, kind: output, shape index: {}]  }
   0x1   :  { %11 = vsyncpa [#allocation4], 0  ;;  %s2102_s18 = smov [#allocation2]   ;;  %s2054_s22 = scalar_lea.hbm %s2418_s0, 256 }
   0x2   :  { %s17_s19 = sshll.u32 %s2102_s18, 4  ;;  %p2055_p0 = scmp.ne.s32.totalorder %s2418_s0, %s2054_s22  ;;  %s18_s19 = int_to_ptr.vmem [resolvable:$true] %s17_s19 }
   0x3   :  { %p2058_p1 = scmp.lt.u32.totalorder %s2054_s22, %s2418_s0 }
   0x5   :  { %p2060_p2 = pnand %p2058_p1, %p2055_p0 }
   0x7   :  { %2063 = shalt.err (!%p2060_p2)
}
   0x8   :  { %s2064_s27 = scalar_lea.vmem %s18_s19, 256  ;;  %p2069_p4 = scmp.lt.s32.totalorder %s18_s19, %s18_s19 }
   0x9   :  { %p2065_p3 = scmp.ne.s32.totalorder %s18_s19, %s2064_s27  ;;  %p2070_p5 = scmp.lt.s32.totalorder %s2064_s27, %s2064_s27 }
   0xb   :  { %p2071_p6 = por %p2070_p5, %p2069_p4 }
   0xd   :  { %p2072_p7 = pnand %p2071_p6, %p2065_p3 }
   0xf   :  { %2075 = shalt.err (!%p2072_p7)
}
  0x10   :  { %s2103_s28 = smov 128   ;;  %s2104_s29 = smov 8  }
  0x11   :  { %23 = dma.hbm_to_vmem [thread:$0]  %s2418_s0, 256, %s18_s19, [#allocation3], %s2103_s28, %s2103_s28, %s2104_s29  }
  0x12   :  { %2098 = dma.done.wait [#allocation3], 256  }
  0x13   :  { %2099 = vsyncadd [#allocation3], 4294967040  ;;  %v2105_v0 = vmov 0.0   ;;  %v39_v1 = vld [vmem:[%s2419_s1 + $0x8] sm:$0xff]  ;;  %v41_v2 = vld [vmem:[%s2419_s1 + $0x18] sm:$0xff]  ;;  %vm46_vm0 = vcmask 261120  }
  0x14   :  { %117 = vmatprep.mubr.f32.mxu0 %v2105_v0  ;;  %123 = vmatprep.mubr.f32.mxu1 %v2105_v0  ;;  %v38_v3 = vld [vmem:[%s2419_s1] sm:$0xff]  ;;  %v1957_v4 = vpack.c.bf16 %v41_v2, %v39_v1  ;;  %v40_v5 = vld [vmem:[%s2419_s1 + $0x10] sm:$0xff]  ;;  %v43_v6 = vld [vmem:[%s2419_s1 + $0x28] sm:$0xff]  ;;  %vm2106_vm1 = vmmov 0   ;;  %s2108_s22 = smov 64   ;;  %s2109_s23 = smov 112  }
  0x15   :  { %v45_v7 = vld [vmem:[%s2419_s1 + $0x38] sm:$0xff]  ;;  %v1959_v8 = vpack.c.bf16 %v40_v5, %v38_v3  ;;  %v42_v10 = vld [vmem:[%s2419_s1 + $0x20] sm:$0xff]  ;;  %v44_v11 = vld [vmem:[%s2419_s1 + $0x30] sm:$0xff]  ;;  %s2107_s1 = smov 48   ;;  %s2110_s24 = smov 96   ;;  %vm133_vm2 = vcmask 130048  }
  0x16   :  { %v1961_v9 = vpack.c.bf16 %v45_v7, %v43_v6  ;;  %1958 = vmatprep.subr.bf16.mxu0 %v1957_v4  ;;  %1989 = vmatprep.subr.bf16.mxu1 %v1957_v4  ;;  %v1963_v12 = vpack.c.bf16 %v44_v11, %v42_v10  ;;  %v2186_v13 = vld [vmem:[#allocation2] sm:$0xff]  ;;  %v2188_v14 = vld [vmem:[#allocation2 + $0x8] sm:$0xff]  ;;  %s2111_s25 = smov 32   ;;  %s2112_s26 = smov 16   ;;  %vm753_vm3 = vcmask 64512   ;;  %vm1614_vm8 = vcmask 523264  }
  0x17   :  { %1960 = vmatpush1.bf16.msra.mxu0 %v1959_v8  ;;  %1991 = vmatpush1.bf16.msra.mxu1 %v1959_v8  ;;  %s2113_s27 = smov 80  }
  0x18   :  { %1962 = vmatprep.subr.bf16.mxu0 %v1961_v9  ;;  %1990 = vmatprep.subr.bf16.mxu1 %v1961_v9 }
  0x1b   :  { %1964 = vmatpush1.bf16.msra.mxu0 %v1963_v12  ;;  %1992 = vmatpush1.bf16.msra.mxu1 %v1963_v12 }
  0x1c   :  { %1847 = vmatprep.subr.mxu1 %v2105_v0  ;;  %1862 = vmatprep.subr.mxu0 %v2105_v0 }
  0x1e   :  { %1769 = vmatmul.mubr.msk.f32.vlgmr.msra.gmra.mrb[0].mxu0 %vm46_vm0, %v2186_v13  ;;  %1770 = vmatmul.mubr.msk.f32.vlgmr.msra.gmra.mrb[0].mxu1 %vm46_vm0, %v2188_v14 }
  0x1f   :  { %1849 = vmatprep.mubr.msk.f32.mxu1 %vm2106_vm1, %v2105_v0  ;;  %1864 = vmatprep.mubr.msk.f32.mxu0 %vm2106_vm1, %v2105_v0 }
  0xf1   :  { %v119_v15 = vpop.f32.mrb[0].mxu0  ;;  %v125_v16 = vpop.f32.mrb[0].mxu1 }
  0xf2   :  { %287 = vrot.lane.b32.xlu1 %v119_v15, %s2107_s1  ;;  %131 = vrot.lane.b32.xlu0 %v119_v15, %s2108_s22  ;;  %v2201_v17 = vpop.f32.mrb[1].mxu0  ;;  %v2203_v18 = vpop.f32.mrb[1].mxu1 }
  0xf6   :  { %285 = vrot.lane.b32.xlu1 %v119_v15, %s2109_s23  ;;  %209 = vrot.lane.b32.xlu0 %v125_v16, %s2108_s22 }
  0xfa   :  { %441 = vrot.lane.b32.xlu1 %v119_v15, %s2110_s24  ;;  %443 = vrot.lane.b32.xlu0 %v119_v15, %s2111_s25 }
  0xfe   :  { %599 = vrot.lane.b32.xlu1 %v119_v15, %s2112_s26  ;;  %365 = vrot.lane.b32.xlu0 %v125_v16, %s2107_s1 }
 0x102   :  { %597 = vrot.lane.b32.xlu1 %v119_v15, %s2113_s27  ;;  %363 = vrot.lane.b32.xlu0 %v125_v16, %s2109_s23 }
 0x106   :  { %519 = vrot.lane.b32.xlu1 %v125_v16, %s2110_s24  ;;  %521 = vrot.lane.b32.xlu0 %v125_v16, %s2111_s25 }
 0x10a   :  { %675 = vrot.lane.b32.xlu1 %v125_v16, %s2113_s27  ;;  %677 = vrot.lane.b32.xlu0 %v125_v16, %s2112_s26 }
 0x164   :  { %v288_v19 = vpop.permute.xlu1 %287  ;;  %v132_v20 = vpop.permute.xlu0 %131 }
 0x165   :  { %1848 = vmatpush3.xpose.msk.msra.mxu1 %vm133_vm2, %v132_v20 }
 0x166   :  { %1852 = vmatprep.subr.mxu1 %v2105_v0 }
 0x168   :  { %v286_v21 = vpop.permute.xlu1 %285  ;;  %1850 = vmatmul.mubr.msk.f32.vlgmr.msra.gmra.mrb[2].mxu1 %vm133_vm2, %v119_v15  ;;  %v210_v22 = vpop.permute.xlu0 %209 }
 0x169   :  { %1853 = vmatpush3.xpose.msk.msra.mxu1 %vm133_vm2, %v210_v22  ;;  %1854 = vmatprep.mubr.msk.f32.mxu1 %vm2106_vm1, %v2105_v0 }
 0x16a   :  { %1857 = vmatprep.subr.mxu1 %v2105_v0 }
 0x16c   :  { %v442_v23 = vpop.permute.xlu1 %441  ;;  %1855 = vmatmul.mubr.msk.f32.vlgmr.msra.gmra.mrb[4].mxu1 %vm133_vm2, %v125_v16  ;;  %v444_v24 = vpop.permute.xlu0 %443 }
 0x16d   :  { %1858 = vmatpush3.xpose.msk.msra.mxu1 %vm133_vm2, %v288_v19  ;;  %1859 = vmatprep.mubr.msk.f32.mxu1 %vm2106_vm1, %v2105_v0 }
 0x16e   :  { %1867 = vmatprep.subr.mxu1 %v2105_v0 }
 0x170   :  { %v600_v25 = vpop.permute.xlu1 %599  ;;  %1860 = vmatmul.mubr.msk.f32.vlgmr.msra.gmra.mrb[6].mxu1 %vm133_vm2, %v286_v21  ;;  %v366_v26 = vpop.permute.xlu0 %365 }
 0x171   :  { %1863 = vmatpush3.xpose.msk.msra.mxu0 %vm133_vm2, %v366_v26  ;;  %1868 = vmatpush3.xpose.msk.msra.mxu1 %vm133_vm2, %v444_v24 }
 0x172   :  { %1869 = vmatprep.mubr.msk.f32.mxu1 %vm2106_vm1, %v2105_v0  ;;  %1877 = vmatprep.subr.mxu1 %v2105_v0 }
 0x173   :  { %1872 = vmatprep.subr.mxu0 %v2105_v0 }
 0x174   :  { %v598_v27 = vpop.permute.xlu1 %597  ;;  %1870 = vmatmul.mubr.msk.f32.vlgmr.msra.gmra.mrb[8].mxu1 %vm133_vm2, %v442_v23  ;;  %v364_v28 = vpop.permute.xlu0 %363 }
 0x175   :  { %1865 = vmatmul.mubr.msk.f32.vlgmr.msra.gmra.mrb[2].mxu0 %vm133_vm2, %v364_v28  ;;  %1878 = vmatpush3.xpose.msk.msra.mxu1 %vm133_vm2, %v600_v25 }
 0x176   :  { %1879 = vmatprep.mubr.msk.f32.mxu1 %vm2106_vm1, %v2105_v0  ;;  %1874 = vmatprep.mubr.msk.f32.mxu0 %vm2106_vm1, %v2105_v0 }
 0x177   :  { %1887 = vmatprep.subr.mxu1 %v2105_v0 }
 0x178   :  { %1880 = vmatmul.mubr.msk.f32.vlgmr.msra.gmra.mrb[10].mxu1 %vm133_vm2, %v598_v27  ;;  %v522_v29 = vpop.permute.xlu0 %521  ;;  %v520_v30 = vpop.permute.xlu1 %519 }
 0x179   :  { %1873 = vmatpush3.xpose.msk.msra.mxu0 %vm133_vm2, %v522_v29  ;;  %1889 = vmatprep.mubr.msk.f32.mxu1 %vm2106_vm1, %v2105_v0 }
 0x17a   :  { %1882 = vmatprep.subr.mxu0 %v2105_v0 }
 0x17c   :  { %1875 = vmatmul.mubr.msk.f32.vlgmr.msra.gmra.mrb[4].mxu0 %vm133_vm2, %v520_v30  ;;  %v678_v31 = vpop.permute.xlu0 %677  ;;  %v676_v32 = vpop.permute.xlu1 %675 }
 0x17d   :  { %1883 = vmatpush3.xpose.msk.msra.mxu0 %vm133_vm2, %v678_v31  ;;  %1884 = vmatprep.mubr.msk.f32.mxu0 %vm2106_vm1, %v2105_v0 }
 0x17e   :  { %1892 = vmatprep.subr.mxu0 %v2105_v0 }
 0x180   :  { %1885 = vmatmul.mubr.msk.f32.vlgmr.msra.gmra.mrb[6].mxu0 %vm133_vm2, %v676_v32 }
 0x181   :  { %1893 = vmatpush3.msra.mxu0 %v2201_v17  ;;  %1894 = vmatprep.mubr.msk.f32.mxu0 %vm2106_vm1, %v2105_v0 }
 0x182   :  { %1902 = vmatprep.subr.mxu0 %v2105_v0 }
 0x23b   :  { %v204_v33 = vpop.f32.mrb[2].mxu1 }
 0x23c   :  { %v1851_v34 = vpop.f32.mrb[3].mxu1  ;;  %v754_v35 = vsel %vm753_vm3, %v204_v33, -inf }
 0x23d   :  { %755 = vmax.xlane.f32.xlu1 %v754_v35 }
 0x23f   :  { %v281_v36 = vpop.f32.mrb[4].mxu1 }
 0x240   :  { %v1856_v37 = vpop.f32.mrb[5].mxu1  ;;  %v757_v52 = vsel %vm753_vm3, %v281_v36, -inf }
 0x243   :  { %v359_v38 = vpop.f32.mrb[6].mxu1 }
 0x244   :  { %v1861_v39 = vpop.f32.mrb[7].mxu1  ;;  %v760_v40 = vsel %vm753_vm3, %v359_v38, -inf }
 0x245   :  { %761 = vmax.xlane.f32.xlu0 %v760_v40 }
 0x247   :  { %v515_v41 = vpop.f32.mrb[8].mxu1 }
 0x248   :  { %v437_v42 = vpop.f32.mrb[2].mxu0  ;;  %v1871_v43 = vpop.f32.mrb[9].mxu1  ;;  %v766_v44 = vsel %vm753_vm3, %v515_v41, -inf }
 0x249   :  { %767 = vmax.xlane.f32.xlu0 %v766_v44  ;;  %v1866_v45 = vpop.f32.mrb[3].mxu0  ;;  %v763_v46 = vsel %vm753_vm3, %v437_v42, -inf }
 0x24a   :  { %764 = vmax.xlane.f32.xlu1 %v763_v46 }
 0x24b   :  { %v671_v47 = vpop.f32.mrb[10].mxu1 }
 0x24c   :  { %v1881_v48 = vpop.f32.mrb[11].mxu1  ;;  %v772_v49 = vsel %vm753_vm3, %v671_v47, -inf }
 0x24d   :  { %773 = vmax.xlane.f32.xlu0 %v772_v49 }
 0x24f   :  { %v593_v50 = vpop.f32.mrb[4].mxu0 }
 0x250   :  { %v1876_v51 = vpop.f32.mrb[5].mxu0  ;;  %v769_v53 = vsel %vm753_vm3, %v593_v50, -inf }
 0x251   :  { %758 = vmax.xlane.f32.xlu0 %v757_v52  ;;  %770 = vmax.xlane.f32.xlu1 %v769_v53 }
 0x253   :  { %v749_v54 = vpop.f32.mrb[6].mxu0 }
 0x254   :  { %v1886_v55 = vpop.f32.mrb[7].mxu0  ;;  %v775_v56 = vsel %vm753_vm3, %v749_v54, -inf }
 0x255   :  { %776 = vmax.xlane.f32.xlu0 %v775_v56 }
 0x262   :  { %843 = vrot.lane.b32.xlu1 %v2201_v17, %s2110_s24 }
 0x2ca   :  { %v756_v57 = vpop.xlane.xlu1 %755 }
 0x2cb   :  { %v778_v58 = vsub.f32 %v204_v33, %v756_v57 }
 0x2cd   :  { %v786_v59 = vmul.f32 1.442695, %v778_v58 }
 0x2cf   :  { %2006 = vpow2.f32 %v786_v59 }
 0x2d2   :  { %v762_v60 = vpop.xlane.xlu0 %761 }
 0x2d3   :  { %v780_v5 = vsub.f32 %v359_v38, %v762_v60 }
 0x2d5   :  { %v790_v15 = vmul.f32 1.442695, %v780_v5  ;;  %v1450_v5 = vlaneseq }
 0x2d6   :  { %v768_v61 = vpop.xlane.xlu0 %767 }
 0x2d7   :  { %v765_v62 = vpop.xlane.xlu1 %764  ;;  %v782_v16 = vsub.f32 %v515_v41, %v768_v61 }
 0x2d8   :  { %v781_v63 = vsub.f32 %v437_v42, %v765_v62 }
 0x2d9   :  { %v2007_v1 = vpop.eup %2006  ;;  %v794_v25 = vmul.f32 1.442695, %v782_v16 }
 0x2da   :  { %v792_v2 = vmul.f32 1.442695, %v781_v63  ;;  %v774_v3 = vpop.xlane.xlu0 %773  ;;  %v802_v4 = vsel %vm753_vm3, %v2007_v1, 0.0 }
 0x2db   :  { %803 = vadd.xlane.f32.xlu0 %v802_v4  ;;  %v784_v10 = vsub.f32 %v671_v47, %v774_v3 }
 0x2dc   :  { %2008 = vpow2.f32 %v792_v2 }
 0x2dd   :  { %v798_v22 = vmul.f32 1.442695, %v784_v10 }
 0x2de   :  { %v759_v6 = vpop.xlane.xlu0 %758  ;;  %v771_v7 = vpop.xlane.xlu1 %770 }
 0x2df   :  { %v779_v8 = vsub.f32 %v281_v36, %v759_v6  ;;  %v783_v9 = vsub.f32 %v593_v50, %v771_v7  ;;  %v2322_v6 = vshrl.u32 %v1450_v5, 7 }
 0x2e1   :  { %v788_v11 = vmul.f32 1.442695, %v779_v8  ;;  %v796_v12 = vmul.f32 1.442695, %v783_v9  ;;  %v1452_v10 = vsub.s32 0, %v2322_v6 }
 0x2e2   :  { %v844_v19 = vpop.permute.xlu1 %843  ;;  %v777_v20 = vpop.xlane.xlu0 %776 }
 0x2e3   :  { %2010 = vpow2.f32 %v788_v11  ;;  %v785_v21 = vsub.f32 %v749_v54, %v777_v20  ;;  %1888 = vmatpush3.msra.mxu1 %v844_v19  ;;  %v2328_v11 = vld [vmem:[%s2422_s4] sm:$0xff] }
 0x2e4   :  { %2012 = vpow2.f32 %v796_v12  ;;  %1897 = vmatprep.subr.mxu1 %v2105_v0  ;;  %v1453_v19 = vrot.slane %v2328_v11, %v1452_v10 }
 0x2e5   :  { %v800_v23 = vmul.f32 1.442695, %v785_v21  ;;  %2014 = vpow2.f32 %v790_v15 }
 0x2e6   :  { %v2264_v24 = vpop.eup %2008 }
 0x2e7   :  { %2016 = vpow2.f32 %v800_v23  ;;  %v811_v26 = vsel %vm753_vm3, %v2264_v24, 0.0 }
 0x2e8   :  { %812 = vadd.xlane.f32.xlu1 %v811_v26  ;;  %2018 = vpow2.f32 %v798_v22 }
 0x2e9   :  { %2020 = vpow2.f32 %v794_v25 }
 0x2ed   :  { %v2268_v27 = vpop.eup %2010 }
 0x2ee   :  { %v2270_v28 = vpop.eup %2012  ;;  %v805_v29 = vsel %vm753_vm3, %v2268_v27, 0.0 }
 0x2ef   :  { %v817_v30 = vsel %vm753_vm3, %v2270_v28, 0.0  ;;  %806 = vadd.xlane.f32.xlu0 %v805_v29  ;;  %v2015_v31 = vpop.eup %2014 }
 0x2f0   :  { %818 = vadd.xlane.f32.xlu1 %v817_v30  ;;  %v808_v35 = vsel %vm753_vm3, %v2015_v31, 0.0 }
 0x2f1   :  { %v2276_v32 = vpop.eup %2016 }
 0x2f2   :  { %v823_v33 = vsel %vm753_vm3, %v2276_v32, 0.0  ;;  %v2019_v34 = vpop.eup %2018 }
 0x2f3   :  { %824 = vadd.xlane.f32.xlu0 %v823_v33  ;;  %v2021_v36 = vpop.eup %2020  ;;  %v820_v37 = vsel %vm753_vm3, %v2019_v34, 0.0 }
 0x2f4   :  { %809 = vadd.xlane.f32.xlu1 %v808_v35  ;;  %v814_v38 = vsel %vm753_vm3, %v2021_v36, 0.0 }
 0x2f7   :  { %821 = vadd.xlane.f32.xlu0 %v820_v37 }
 0x2f8   :  { %815 = vadd.xlane.f32.xlu1 %v814_v38 }
 0x309   :  { %1069 = vrot.lane.b32.xlu1 %v2201_v17, %s2111_s25 }
 0x30d   :  { %1147 = vrot.lane.b32.xlu1 %v2203_v18, %s2110_s24  ;;  %992 = vrot.lane.b32.xlu0 %v2201_v17, %s2108_s22 }
 0x311   :  { %1373 = vrot.lane.b32.xlu1 %v2203_v18, %s2111_s25  ;;  %1296 = vrot.lane.b32.xlu0 %v2203_v18, %s2108_s22 }
 0x368   :  { %v804_v39 = vpop.xlane.xlu0 %803 }
 0x369   :  { %2022 = vrcp.f32 %v804_v39 }
 0x373   :  { %v2023_v40 = vpop.eup %2022 }
 0x374   :  { %v834_v41 = vmul.f32 %v2023_v40, %v2007_v1 }
 0x375   :  { %v813_v42 = vpop.xlane.xlu1 %812 }
 0x376   :  { %1895 = vmatmul.mubr.msk.f32.vlgmr.msra.gmra.mrb[8].mxu0 %vm753_vm3, %v834_v41 }
 0x377   :  { %1904 = vmatprep.mubr.msk.f32.mxu0 %vm2106_vm1, %v2105_v0 }
 0x37c   :  { %v807_v43 = vpop.xlane.xlu0 %806 }
 0x37d   :  { %v819_v44 = vpop.xlane.xlu1 %818 }
 0x380   :  { %v825_v45 = vpop.xlane.xlu0 %824 }
 0x381   :  { %v810_v17 = vpop.xlane.xlu1 %809 }
 0x382   :  { %2024 = vrcp.f32 %v810_v17 }
 0x384   :  { %v822_v46 = vpop.xlane.xlu0 %821 }
 0x385   :  { %v816_v47 = vpop.xlane.xlu1 %815  ;;  %2026 = vrcp.f32 %v822_v46  ;;  %v1511_v46 = vld [vmem:[%s2420_s2] sm:$0xff] }
 0x386   :  { %2028 = vrcp.f32 %v816_v47  ;;  %v1512_v47 = vld [vmem:[%s2420_s2 + $0x8] sm:$0xff] }
 0x387   :  { %2030 = vrcp.f32 %v807_v43 }
 0x388   :  { %2032 = vrcp.f32 %v813_v42  ;;  %v993_v52 = vpop.permute.xlu0 %992 }
 0x389   :  { %v1070_v48 = vpop.permute.xlu1 %1069  ;;  %2034 = vrcp.f32 %v825_v45 }
 0x38a   :  { %1903 = vmatpush3.msra.mxu0 %v1070_v48  ;;  %2036 = vrcp.f32 %v819_v44  ;;  %v1965_v48 = vpack.c.bf16 %v1512_v47, %v1511_v46 }
 0x38b   :  { %1912 = vmatprep.subr.mxu0 %v2105_v0 }
 0x38c   :  { %v2025_v49 = vpop.eup %2024 }
 0x38d   :  { %v836_v50 = vmul.f32 %v2025_v49, %v2015_v31  ;;  %v1148_v55 = vpop.permute.xlu1 %1147  ;;  %v1513_v49 = vld [vmem:[%s2420_s2 + $0x10] sm:$0xff] }
 0x38f   :  { %v2027_v51 = vpop.eup %2026  ;;  %1890 = vmatmul.mubr.msk.f32.vlgmr.msra.gmra.mrb[12].mxu1 %vm753_vm3, %v836_v50  ;;  %v1514_v50 = vld [vmem:[%s2420_s2 + $0x18] sm:$0xff] }
 0x390   :  { %v2029_v53 = vpop.eup %2028  ;;  %v840_v54 = vmul.f32 %v2027_v51, %v2019_v34  ;;  %1898 = vmatpush3.msra.mxu1 %v993_v52  ;;  %1899 = vmatprep.mubr.msk.f32.mxu1 %vm2106_vm1, %v2105_v0  ;;  %v1969_v51 = vpack.c.bf16 %v1514_v50, %v1513_v49  ;;  %v1602_v52 = vld [vmem:[%s2421_s3] sm:$0xff] }
 0x391   :  { %v2031_v56 = vpop.eup %2030  ;;  %v838_v57 = vmul.f32 %v2029_v53, %v2021_v36  ;;  %1907 = vmatprep.subr.mxu1 %v2105_v0  ;;  %v1374_v63 = vpop.permute.xlu1 %1373  ;;  %v1603_v53 = vld [vmem:[%s2421_s3 + $0x8] sm:$0xff] }
 0x392   :  { %v2033_v58 = vpop.eup %2032  ;;  %1905 = vmatmul.mubr.msk.f32.vlgmr.msra.gmra.mrb[10].mxu0 %vm753_vm3, %v840_v54  ;;  %v835_v59 = vmul.f32 %v2031_v56, %v2268_v27  ;;  %v1604_v54 = vld [vmem:[%s2421_s3 + $0x10] sm:$0xff]  ;;  %v1605_v56 = vld [vmem:[%s2421_s3 + $0x18] sm:$0xff] }
 0x393   :  { %1900 = vmatmul.mubr.msk.f32.vlgmr.msra.gmra.mrb[14].mxu1 %vm753_vm3, %v838_v57  ;;  %1913 = vmatpush3.msra.mxu0 %v2203_v18  ;;  %v2035_v60 = vpop.eup %2034  ;;  %v837_v61 = vmul.f32 %v2033_v58, %v2264_v24  ;;  %v1297_v18 = vpop.permute.xlu0 %1296  ;;  %v1977_v57 = vpack.c.bf16 %v1605_v56, %v1604_v54  ;;  %v1606_v58 = vld [vmem:[%s2421_s3 + $0x20] sm:$0xff] }
 0x394   :  { %1908 = vmatpush3.msra.mxu1 %v1148_v55  ;;  %1909 = vmatprep.mubr.msk.f32.mxu1 %vm2106_vm1, %v2105_v0  ;;  %v2037_v62 = vpop.eup %2036  ;;  %v841_v1 = vmul.f32 %v2035_v60, %v2276_v32  ;;  %v1973_v55 = vpack.c.bf16 %v1603_v53, %v1602_v52 }
 0x395   :  { %1914 = vmatprep.mubr.msk.f32.mxu0 %vm2106_vm1, %v2105_v0  ;;  %1917 = vmatprep.subr.mxu1 %v2105_v0  ;;  %v839_v2 = vmul.f32 %v2037_v62, %v2270_v28 }
 0x396   :  { %1922 = vmatprep.subr.mxu0 %v2105_v0  ;;  %1915 = vmatmul.mubr.msk.f32.vlgmr.msra.gmra.mrb[12].mxu0 %vm753_vm3, %v835_v59  ;;  %v1607_v59 = vld [vmem:[%s2421_s3 + $0x28] sm:$0xff] }
 0x397   :  { %1910 = vmatmul.mubr.msk.f32.vlgmr.msra.gmra.mrb[16].mxu1 %vm753_vm3, %v837_v61  ;;  %1923 = vmatpush3.msra.mxu0 %v1374_v63  ;;  %v1981_v60 = vpack.c.bf16 %v1607_v59, %v1606_v58 }
 0x398   :  { %1918 = vmatpush3.msra.mxu1 %v1297_v18  ;;  %1919 = vmatprep.mubr.msk.f32.mxu1 %vm2106_vm1, %v2105_v0 }
 0x399   :  { %1924 = vmatprep.mubr.msk.f32.mxu0 %vm2106_vm1, %v2105_v0  ;;  %1966 = vmatprep.subr.bf16.mxu1 %v1965_v48 }
 0x39a   :  { %1925 = vmatmul.mubr.msk.f32.vlgmr.msra.gmra.mrb[14].mxu0 %vm753_vm3, %v841_v1  ;;  %1974 = vmatprep.subr.bf16.mxu0 %v1973_v55 }
 0x39b   :  { %1920 = vmatmul.mubr.msk.f32.vlgmr.msra.gmra.mrb[18].mxu1 %vm753_vm3, %v839_v2  ;;  %1976 = vmatpush3.bf16.msra.mxu0 %v1973_v55 }
 0x39c   :  { %1968 = vmatpush3.bf16.msra.mxu1 %v1965_v48  ;;  %1978 = vmatprep.subr.bf16.mxu0 %v1977_v57 }
 0x39d   :  { %1970 = vmatprep.subr.bf16.mxu1 %v1969_v51 }
 0x39f   :  { %1980 = vmatpush3.bf16.msra.mxu0 %v1977_v57 }
 0x3a0   :  { %1972 = vmatpush3.bf16.msra.mxu1 %v1969_v51  ;;  %1982 = vmatprep.subr.bf16.mxu0 %v1981_v60 }
 0x3a3   :  { %1984 = vmatpush3.bf16.msra.mxu0 %v1981_v60 }
 0x449   :  { %v988_v3 = vpop.f32.mrb[8].mxu0 }
 0x44a   :  { %v1896_v4 = vpop.f32.mrb[9].mxu0 }
 0x462   :  { %v915_v7 = vpop.f32.mrb[12].mxu1 }
 0x463   :  { %v989_v8 = vadd.f32 %v988_v3, %v915_v7  ;;  %v1891_v9 = vpop.f32.mrb[13].mxu1 }
 0x465   :  { %v1141_v0 = vpop.f32.mrb[10].mxu0 }
 0x466   :  { %v1064_v12 = vpop.f32.mrb[14].mxu1  ;;  %v1906_v15 = vpop.f32.mrb[11].mxu0 }
 0x467   :  { %v1068_v16 = vadd.f32 %v1064_v12, %v989_v8  ;;  %v1901_v20 = vpop.f32.mrb[15].mxu1  ;;  %v1501_v15 = vsub.s32 1, %v2322_v6 }
 0x469   :  { %v1145_v21 = vadd.f32 %v1141_v0, %v1068_v16  ;;  %v1292_v22 = vpop.f32.mrb[12].mxu0  ;;  %v1502_v20 = vrot.slane %v2328_v11, %v1501_v15 }
 0x46a   :  { %v1219_v23 = vpop.f32.mrb[16].mxu1  ;;  %v1916_v24 = vpop.f32.mrb[13].mxu0 }
 0x46b   :  { %v1454_v25 = vadd.f32 %v1453_v19, %v1145_v21  ;;  %v1293_v26 = vadd.f32 %v1292_v22, %v1219_v23  ;;  %v1911_v27 = vpop.f32.mrb[17].mxu1 }
 0x46d   :  { %v1445_v28 = vpop.f32.mrb[14].mxu0  ;;  %v1456_v29 = vadd.f32 %v1454_v25, %v2186_v13 }
 0x46e   :  { %v1368_v30 = vpop.f32.mrb[18].mxu1  ;;  %v1926_v31 = vpop.f32.mrb[15].mxu0 }
 0x46f   :  { %v1372_v32 = vadd.f32 %v1368_v30, %v1293_v26  ;;  %v1921_v33 = vpop.f32.mrb[19].mxu1  ;;  %v1458_v34 = vsel %vm46_vm0, %v1456_v29, 0.0  ;;  %v1608_v30 = vld [vmem:[%s2421_s3 + $0x30] sm:$0xff]  ;;  %v1609_v31 = vld [vmem:[%s2421_s3 + $0x38] sm:$0xff]  ;;  %s2114_s3 = smov [#allocation5]  }
 0x470   :  { %1459 = vadd.xlane.f32.xlu0 %v1458_v34  ;;  %v1517_v33 = vsub.s32 3, %v2322_v6  ;;  %s1757_s27 = sshll.u32 %s2114_s3, 4  ;;  %s1758_s27 = int_to_ptr.vmem [resolvable:$true] %s1757_s27 }
 0x471   :  { %v1449_v35 = vadd.f32 %v1445_v28, %v1372_v32  ;;  %v1985_v32 = vpack.c.bf16 %v1609_v31, %v1608_v30  ;;  %s2076_s30 = scalar_lea.vmem %s1758_s27, 256  ;;  %p2081_p9 = scmp.lt.s32.totalorder %s1758_s27, %s1758_s27 }
 0x472   :  { %v1518_v34 = vrot.slane %v2328_v11, %v1517_v33  ;;  %p2077_p8 = scmp.ne.s32.totalorder %s1758_s27, %s2076_s30  ;;  %p2082_p10 = scmp.lt.s32.totalorder %s2076_s30, %s2076_s30 }
 0x473   :  { %v1455_v36 = vadd.f32 %v1453_v19, %v1449_v35  ;;  %v1507_v19 = vsub.s32 2, %v2322_v6  ;;  %1986 = vmatprep.subr.bf16.mxu0 %v1985_v32 }
 0x474   :  { %1988 = vmatpush3.bf16.msra.mxu0 %v1985_v32  ;;  %p2083_p11 = por %p2082_p10, %p2081_p9 }
 0x475   :  { %v1457_v37 = vadd.f32 %v1455_v36, %v2188_v14  ;;  %v1508_v23 = vrot.slane %v2328_v11, %v1507_v19 }
 0x476   :  { %p2084_p12 = pnand %p2083_p11, %p2077_p8 }
 0x477   :  { %v1461_v38 = vsel %vm46_vm0, %v1457_v37, 0.0 }
 0x478   :  { %1462 = vadd.xlane.f32.xlu1 %v1461_v38 }
 0x4fd   :  { %v1460_v39 = vpop.xlane.xlu0 %1459 }
 0x4fe   :  { %v1465_v40 = vmul.f32 0.03125, %v1460_v39 }
 0x500   :  { %v2335_v41 = vsub.f32 %v1456_v29, %v1465_v40 }
 0x502   :  { %v1469_v13 = vmul.f32 %v2335_v41, %v2335_v41 }
 0x504   :  { %v1471_v42 = vsel %vm46_vm0, %v1469_v13, 0.0 }
 0x505   :  { %1472 = vadd.xlane.f32.xlu0 %v1471_v42  ;;  %v1463_v43 = vpop.xlane.xlu1 %1462 }
 0x506   :  { %v1466_v44 = vmul.f32 0.03125, %v1463_v43 }
 0x508   :  { %v2340_v45 = vsub.f32 %v1457_v37, %v1466_v44 }
 0x50a   :  { %v1470_v14 = vmul.f32 %v2340_v45, %v2340_v45 }
 0x50c   :  { %v1474_v17 = vsel %vm46_vm0, %v1470_v14, 0.0 }
 0x50d   :  { %1475 = vadd.xlane.f32.xlu0 %v1474_v17 }
 0x592   :  { %v1473_v61 = vpop.xlane.xlu0 %1472 }
 0x593   :  { %v1477_v62 = vmul.f32 0.032258064, %v1473_v61 }
 0x595   :  { %2038 = vrsqrt.f32 %v1477_v62  ;;  %vm1481_vm4 = vcmp.eq.f32.partialorder %v1477_v62, inf  ;;  %v1484_v3 = vand.u32 2147483648, %v1477_v62  ;;  %vm1483_vm5 = vcmp.eq.f32.partialorder %v1477_v62, 0.0 }
 0x59a   :  { %v1476_v63 = vpop.xlane.xlu0 %1475 }
 0x59b   :  { %v1478_v18 = vmul.f32 0.032258064, %v1476_v63 }
 0x59d   :  { %2040 = vrsqrt.f32 %v1478_v18  ;;  %vm1488_vm6 = vcmp.eq.f32.partialorder %v1478_v18, inf  ;;  %v1491_v10 = vand.u32 2147483648, %v1478_v18  ;;  %vm1490_vm7 = vcmp.eq.f32.partialorder %v1478_v18, 0.0 }
 0x59f   :  { %v2039_v1 = vpop.eup %2038 }
 0x5a0   :  { %v1480_v2 = vmul.f32 %v2039_v1, %v1477_v62 }
 0x5a2   :  { %v1482_v4 = vsel %vm1481_vm4, %v1477_v62, %v1480_v2 }
 0x5a3   :  { %v1485_v5 = vsel %vm1483_vm5, %v1484_v3, %v1482_v4 }
 0x5a4   :  { %v1493_v7 = vadd.f32 0.001, %v1485_v5 }
 0x5a6   :  { %2042 = vrcp.f32 %v1493_v7 }
 0x5a7   :  { %v2041_v8 = vpop.eup %2040 }
 0x5a8   :  { %v1487_v9 = vmul.f32 %v2041_v8, %v1478_v18 }
 0x5aa   :  { %v1489_v0 = vsel %vm1488_vm6, %v1478_v18, %v1487_v9 }
 0x5ab   :  { %v1492_v12 = vsel %vm1490_vm7, %v1491_v10, %v1489_v0  ;;  %v1740_v0 = vsub.s32 5, %v2322_v6 }
 0x5ac   :  { %v1494_v16 = vadd.f32 0.001, %v1492_v12  ;;  %v1746_v12 = vsub.s32 6, %v2322_v6 }
 0x5ad   :  { %v1741_v15 = vrot.slane %v2328_v11, %v1740_v0 }
 0x5ae   :  { %2044 = vrcp.f32 %v1494_v16 }
 0x5b0   :  { %v2043_v21 = vpop.eup %2042 }
 0x5b1   :  { %v1496_v22 = vmul.f32 %v2043_v21, %v2335_v41  ;;  %v1612_v41 = vsub.s32 4, %v2322_v6  ;;  %v1747_v21 = vrot.slane %v2328_v11, %v1746_v12 }
 0x5b3   :  { %v1503_v24 = vmul.f32 %v1502_v20, %v1496_v22  ;;  %v1613_v13 = vrot.slane %v2328_v11, %v1612_v41 }
 0x5b5   :  { %v1509_v25 = vadd.f32 %v1508_v23, %v1503_v24 }
 0x5b7   :  { %1935 = vmatprep.mubr.msk.f32.mxu1 %vm46_vm0, %v1509_v25 }
 0x5b8   :  { %v2045_v26 = vpop.eup %2044 }
 0x5b9   :  { %v1498_v27 = vmul.f32 %v2045_v26, %v2340_v45 }
 0x5bb   :  { %v1504_v28 = vmul.f32 %v1502_v20, %v1498_v27 }
 0x5bd   :  { %v1510_v29 = vadd.f32 %v1508_v23, %v1504_v28 }
 0x5bf   :  { %1936 = vmatmul.mubr.msk.f32.vlgmr.msra.gmra.mrb[20].mxu1 %vm46_vm0, %v1510_v29 }
 0x692   :  { %v1937_v35 = vpop.f32.mrb[20].mxu1 }
 0x693   :  { %v1597_v36 = vadd.f32 %v1937_v35, %v1518_v34  ;;  %v1591_v37 = vpop.f32.mrb[21].mxu1 }
 0x694   :  { %v1592_v38 = vadd.f32 %v1591_v37, %v1518_v34 }
 0x695   :  { %v1601_v40 = vmax.f32 %v1597_v36, 0.0 }
 0x696   :  { %v1600_v39 = vmax.f32 %v1592_v38, 0.0 }
 0x698   :  { %1954 = vmatprep.mubr.msk.f32.mxu0 %vm1614_vm8, %v1600_v39 }
 0x699   :  { %1955 = vmatmul.mubr.msk.f32.vlgmr.msra.gmra.mrb[16].mxu0 %vm1614_vm8, %v1601_v40 }
 0x76c   :  { %v1956_v42 = vpop.f32.mrb[16].mxu0 }
 0x76d   :  { %v1693_v43 = vadd.f32 %v1956_v42, %v1613_v13  ;;  %v1687_v44 = vpop.f32.mrb[17].mxu0 }
 0x76e   :  { %v1688_v45 = vadd.f32 %v1687_v44, %v1613_v13 }
 0x76f   :  { %v1697_v14 = vadd.f32 %v1693_v43, %v1510_v29 }
 0x770   :  { %v1696_v17 = vadd.f32 %v1688_v45, %v1509_v25 }
 0x771   :  { %v1701_v46 = vsel %vm46_vm0, %v1697_v14, 0.0 }
 0x772   :  { %1702 = vadd.xlane.f32.xlu0 %v1701_v46  ;;  %v1698_v47 = vsel %vm46_vm0, %v1696_v17, 0.0 }
 0x773   :  { %1699 = vadd.xlane.f32.xlu1 %v1698_v47 }
 0x7ff   :  { %v1703_v48 = vpop.xlane.xlu0 %1702 }
 0x800   :  { %v1705_v49 = vmul.f32 0.03125, %v1703_v48  ;;  %v1700_v50 = vpop.xlane.xlu1 %1699 }
 0x801   :  { %v1704_v51 = vmul.f32 0.03125, %v1700_v50 }
 0x802   :  { %v1707_v52 = vsub.f32 %v1697_v14, %v1705_v49 }
 0x803   :  { %v1706_v53 = vsub.f32 %v1696_v17, %v1704_v51 }
 0x804   :  { %v1709_v54 = vmul.f32 %v1707_v52, %v1707_v52 }
 0x805   :  { %v1708_v55 = vmul.f32 %v1706_v53, %v1706_v53 }
 0x806   :  { %v1713_v56 = vsel %vm46_vm0, %v1709_v54, 0.0 }
 0x807   :  { %1714 = vadd.xlane.f32.xlu0 %v1713_v56  ;;  %v1710_v57 = vsel %vm46_vm0, %v1708_v55, 0.0 }
 0x808   :  { %1711 = vadd.xlane.f32.xlu1 %v1710_v57 }
 0x894   :  { %v1715_v58 = vpop.xlane.xlu0 %1714 }
 0x895   :  { %v1717_v59 = vmul.f32 0.032258064, %v1715_v58  ;;  %v1712_v60 = vpop.xlane.xlu1 %1711 }
 0x896   :  { %v1716_v61 = vmul.f32 0.032258064, %v1712_v60 }
 0x897   :  { %2046 = vrsqrt.f32 %v1717_v59  ;;  %vm1727_vm9 = vcmp.eq.f32.partialorder %v1717_v59, inf  ;;  %v1730_v1 = vand.u32 2147483648, %v1717_v59  ;;  %vm1729_vm10 = vcmp.eq.f32.partialorder %v1717_v59, 0.0 }
 0x898   :  { %2048 = vrsqrt.f32 %v1716_v61  ;;  %vm1720_vm11 = vcmp.eq.f32.partialorder %v1716_v61, inf  ;;  %v1723_v4 = vand.u32 2147483648, %v1716_v61  ;;  %vm1722_vm12 = vcmp.eq.f32.partialorder %v1716_v61, 0.0 }
 0x8a1   :  { %v2047_v62 = vpop.eup %2046 }
 0x8a2   :  { %v2049_v63 = vpop.eup %2048  ;;  %v1726_v18 = vmul.f32 %v2047_v62, %v1717_v59 }
 0x8a3   :  { %v1719_v2 = vmul.f32 %v2049_v63, %v1716_v61 }
 0x8a4   :  { %v1728_v3 = vsel %vm1727_vm9, %v1717_v59, %v1726_v18 }
 0x8a5   :  { %v1731_v5 = vsel %vm1729_vm10, %v1730_v1, %v1728_v3  ;;  %v1721_v7 = vsel %vm1720_vm11, %v1716_v61, %v1719_v2 }
 0x8a6   :  { %v1733_v8 = vadd.f32 0.001, %v1731_v5  ;;  %v1724_v9 = vsel %vm1722_vm12, %v1723_v4, %v1721_v7 }
 0x8a7   :  { %v1732_v10 = vadd.f32 0.001, %v1724_v9 }
 0x8a8   :  { %2050 = vrcp.f32 %v1733_v8 }
 0x8a9   :  { %2052 = vrcp.f32 %v1732_v10 }
 0x8b2   :  { %v2051_v16 = vpop.eup %2050 }
 0x8b3   :  { %v2053_v19 = vpop.eup %2052  ;;  %v1737_v20 = vmul.f32 %v2051_v16, %v1707_v52 }
 0x8b4   :  { %v1735_v22 = vmul.f32 %v2053_v19, %v1706_v53 }
 0x8b5   :  { %v1743_v23 = vmul.f32 %v1741_v15, %v1737_v20 }
 0x8b6   :  { %v1742_v24 = vmul.f32 %v1741_v15, %v1735_v22 }
 0x8b7   :  { %v1749_v25 = vadd.f32 %v1747_v21, %v1743_v23 }
 0x8b8   :  { %v1748_v26 = vadd.f32 %v1747_v21, %v1742_v24 }
 0x8b9   :  { %1751 = vst.msk [vmem:[#allocation5 + $0x8] sm:$0xff] %vm46_vm0, %v1749_v25 }
 0x8ba   :  { %1750 = vst.msk [vmem:[#allocation5] sm:$0xff] %vm46_vm0, %v1748_v26 }
 0x8bb   :  { %2087 = shalt.err (!%p2084_p12)
}
 0x8bc   :  { %s2088_s7 = scalar_lea.hbm %s2423_s5, 256 }
 0x8bd   :  { %p2089_p13 = scmp.ne.s32.totalorder %s2423_s5, %s2088_s7  ;;  %p2092_p0 = scmp.lt.u32.totalorder %s2088_s7, %s2423_s5 }
 0x8bf   :  { %p2094_p1 = pnand %p2092_p0, %p2089_p13 }
 0x8c1   :  { %2097 = shalt.err (!%p2094_p1)
}
 0x8c2   :  { %1763 = dma.vmem_to_hbm [thread:$0]  %s1758_s27, 256, %s2423_s5, [#allocation4], %s2103_s28, %s2103_s28, %s2104_s29  }
 0x8c3   :  { %2100 = dma.done.wait [#allocation4], 256  }
 0x8c4   :  { %2101 = vsyncadd [#allocation4], 4294967040 }
 0x8c5   :  { %1767 = vsyncpa [#allocation3], 1 }
 0x8c6   :  { %1768 = vsyncpa [#allocation4], 1 }

</bundles_post_ra>
